<compile_context>
chip_gen: v7x
topology: tpu7x:2x2x1
jax: 0.10.0
libtpu: 0.0.40
codegen_flags: <defaults>
</compile_context>

<pallas_src>
import jax
import jax.numpy as jnp
from jax.experimental import pallas as pl
from jax.experimental.pallas import tpu as pltpu

IMAGE_SIZE = 32                       # stand-in for RAM's 384
PATCH = 8
C = 3
GRID = IMAGE_SIZE // PATCH
NUM_PATCHES = GRID * GRID             # 16
PATCH_DIM = C * PATCH * PATCH         # 192 (K, kept unpadded)
D_MODEL = 32                          # logical hidden width of the stand-in encoder
D_PAD = 128                           # physical, lane-dense hidden width (zero cols)
NUM_TAGS = 128
TAG_THRESHOLD = 0.5                   # logit(0.5) == 0
BLOCK_B = 16                          # images per grid step (256 matmul rows)


# ---------------------------------------------------------------------------
# Single fused kernel (per grid step: B images):
#   raw patches -> (normalize-folded) patch embed -> ReLU
#               -> mean pool (MXU, pooling matrix already carries 1/16)
#               -> tag head -> [sigmoid probs | (logits > 0) mask]  packed
# ---------------------------------------------------------------------------
def _fused_tag_kernel(p_ref, we_ref, be_ref, pool_ref, wt_ref, bt_ref, out_ref):
    # p_ref:   (BLOCK_B*NUM_PATCHES, PATCH_DIM)  raw (un-normalized) patches
    # we_ref:  (PATCH_DIM, D_PAD)                normalize-folded patch-embed weight
    # be_ref:  (1, D_PAD)                        normalize-folded patch-embed bias
    # pool_ref:(BLOCK_B, BLOCK_B*NUM_PATCHES)    block-diag mean-pool matrix (1/16)
    # wt_ref:  (D_PAD, NUM_TAGS)                 tag-classification weight
    # bt_ref:  (1, NUM_TAGS)                     tag-classification bias
    # out_ref: (BLOCK_B, 2*NUM_TAGS)             [probs | mask] packed, lane-dense
    emb = jnp.dot(p_ref[...], we_ref[...],
                  preferred_element_type=jnp.float32) + be_ref[...]
    emb = jnp.maximum(emb, 0.0)                                    # encoder non-lin
    # mean pool over the 16 patches of each image (scale folded into pool_ref)
    pooled = jnp.dot(pool_ref[...], emb, preferred_element_type=jnp.float32)
    logits = jnp.dot(pooled, wt_ref[...],
                     preferred_element_type=jnp.float32) + bt_ref[...]
    out_ref[:, 0:NUM_TAGS] = jax.nn.sigmoid(logits)
    # threshold 0.5  <=>  logits > 0  (independent of the EUP sigmoid result)
    out_ref[:, NUM_TAGS:2 * NUM_TAGS] = (logits > 0.0).astype(jnp.float32)


def tag_head(patches_flat, w_fold, b_fold, pool_mat, w_tag, b_tag, n_pad):
    """patches_flat: (n_pad*NUM_PATCHES, PATCH_DIM); n_pad multiple of BLOCK_B."""
    n_steps = n_pad // BLOCK_B
    packed = pl.pallas_call(
        _fused_tag_kernel,
        out_shape=jax.ShapeDtypeStruct((n_pad, 2 * NUM_TAGS), jnp.float32),
        grid=(n_steps,),
        in_specs=[
            pl.BlockSpec((BLOCK_B * NUM_PATCHES, PATCH_DIM), lambda i: (i, 0)),
            pl.BlockSpec((PATCH_DIM, D_PAD), lambda i: (0, 0)),            # resident
            pl.BlockSpec((1, D_PAD), lambda i: (0, 0)),                    # resident
            pl.BlockSpec((BLOCK_B, BLOCK_B * NUM_PATCHES), lambda i: (0, 0)),
            pl.BlockSpec((D_PAD, NUM_TAGS), lambda i: (0, 0)),             # resident
            pl.BlockSpec((1, NUM_TAGS), lambda i: (0, 0)),                 # resident
        ],
        out_specs=pl.BlockSpec((BLOCK_B, 2 * NUM_TAGS), lambda i: (i, 0)),
        compiler_params=pltpu.CompilerParams(
            dimension_semantics=("parallel",)),   # >=2 steps -> both TCs on v7x
    )(patches_flat, w_fold, b_fold, pool_mat, w_tag, b_tag)
    return packed


# ---------------------------------------------------------------------------
# Host-side glue
# ---------------------------------------------------------------------------
def extract_patches(x):
    """(N, C, H, W) -> (N, NUM_PATCHES, PATCH_DIM), row-major patch order,
    per-patch features ordered (C, ph, pw).  No K padding."""
    n = x.shape[0]
    p = x.reshape(n, C, GRID, PATCH, GRID, PATCH)
    p = p.transpose(0, 2, 4, 1, 3, 5)                 # (N, gh, gw, C, ph, pw)
    return p.reshape(n, NUM_PATCHES, PATCH_DIM)


def fold_normalize(mean, std, w_embed, b_embed):
    """Fold (x - mean)/std into the patch-embed weights (exact, host-side)."""
    ch = jnp.arange(PATCH_DIM) // (PATCH * PATCH)      # channel of each patch row
    inv_std = 1.0 / std                                # exact host reciprocal
    scale = inv_std[ch]                                # (PATCH_DIM,)
    shift = (mean * inv_std)[ch]                       # (PATCH_DIM,)
    w_fold = w_embed * scale[:, None]                  # (PATCH_DIM, D_PAD)
    b_fold = b_embed - shift[None, :] @ w_embed        # (1, D_PAD)
    return w_fold, b_fold


def make_pool_matrix():
    """(BLOCK_B, BLOCK_B*NUM_PATCHES) block-diagonal averaging matrix (1/16)."""
    eye = jnp.eye(BLOCK_B, dtype=jnp.float32)
    return jnp.repeat(eye, NUM_PATCHES, axis=1) * (1.0 / NUM_PATCHES)


@jax.jit
def tagging_forward(images, w_fold, b_fold, pool_mat, w_tag, b_tag):
    """images: (N, C, H, W) float32 in [0,1] (ToTensor already applied)."""
    n = images.shape[0]
    n_pad = ((n + BLOCK_B - 1) // BLOCK_B) * BLOCK_B
    patches = extract_patches(images)                  # (N, 16, 192)
    patches = patches.reshape(n * NUM_PATCHES, PATCH_DIM)
    if n_pad != n:                                     # pad batch to BLOCK_B multiple
        patches = jnp.pad(patches, ((0, (n_pad - n) * NUM_PATCHES), (0, 0)))
    packed = tag_head(patches, w_fold, b_fold, pool_mat, w_tag, b_tag, n_pad)
    probs = packed[:n, :NUM_TAGS]
    mask = packed[:n, NUM_TAGS:]
    return probs, mask


def make_params():
    key = jax.random.PRNGKey(0)
    k1, k2, k3, k4 = jax.random.split(key, 4)
    mean = jnp.array([0.485, 0.456, 0.406], jnp.float32)
    std = jnp.array([0.229, 0.224, 0.225], jnp.float32)
    # logical 192x32 / 32xNUM_TAGS weights, zero-padded to lane-dense hidden width
    w_embed = jax.random.normal(k1, (PATCH_DIM, D_MODEL), jnp.float32) * 0.05
    b_embed = jax.random.normal(k2, (1, D_MODEL), jnp.float32) * 0.01
    w_tag = jax.random.normal(k3, (D_MODEL, NUM_TAGS), jnp.float32) * 0.2
    b_tag = jax.random.normal(k4, (1, NUM_TAGS), jnp.float32) * 0.1
    w_embed = jnp.pad(w_embed, ((0, 0), (0, D_PAD - D_MODEL)))
    b_embed = jnp.pad(b_embed, ((0, 0), (0, D_PAD - D_MODEL)))
    w_tag = jnp.pad(w_tag, ((0, D_PAD - D_MODEL), (0, 0)))
    return mean, std, w_embed, b_embed, w_tag, b_tag


def _reference(images, mean, std, w_embed, b_embed, w_tag, b_tag):
    """Pure-JAX reference of the original (normalize -> embed -> ...) pipeline."""
    xn = (images - mean[None, :, None, None]) / std[None, :, None, None]
    n = images.shape[0]
    p = xn.reshape(n, C, GRID, PATCH, GRID, PATCH)
    p = p.transpose(0, 2, 4, 1, 3, 5).reshape(n, NUM_PATCHES, PATCH_DIM)
    emb = jnp.maximum(p @ w_embed + b_embed, 0.0)
    pooled = jnp.mean(emb, axis=1)
    logits = pooled @ w_tag + b_tag
    return jax.nn.sigmoid(logits)


if __name__ == "__main__":
    mean, std, w_embed, b_embed, w_tag, b_tag = make_params()
    w_fold, b_fold = fold_normalize(mean, std, w_embed, b_embed)
    pool_mat = make_pool_matrix()

    # images in [0,1] as produced by transforms.ToTensor(), NCHW layout
    N = 32
    images = jax.random.uniform(jax.random.PRNGKey(0),
                                (N, C, IMAGE_SIZE, IMAGE_SIZE), jnp.float32)

    probs, mask = tagging_forward(images, w_fold, b_fold, pool_mat, w_tag, b_tag)
    jax.block_until_ready((probs, mask))

    # "return [tag for tag in tags[0].split(' | ')]" -> per-image tag indices
    tag_indices = [
        jnp.nonzero(mask[i] > 0, size=NUM_TAGS, fill_value=-1)[0] for i in range(N)
    ]
    jax.block_until_ready(tag_indices)

    assert probs.shape == (N, NUM_TAGS) and mask.shape == (N, NUM_TAGS)
    assert bool(jnp.all((probs >= 0.0) & (probs <= 1.0)))
    assert bool(jnp.all((mask == 0.0) | (mask == 1.0)))
    ref_probs = _reference(images, mean, std, w_embed, b_embed, w_tag, b_tag)
    assert bool(jnp.allclose(probs, ref_probs, rtol=1e-4, atol=1e-5)), \
        "folded-normalize kernel diverges from reference"
    print("KERNEL_OK")
</pallas_src>

<mosaic_0001>
module attributes {stable_mosaic.version = 11 : i64} {
  func.func @_fused_tag_kernel(%arg0: i32, %arg1: memref<256x192xf32, #tpu.memory_space<vmem>>, %arg2: memref<192x128xf32, #tpu.memory_space<vmem>>, %arg3: memref<1x128xf32, #tpu.memory_space<vmem>>, %arg4: memref<16x256xf32, #tpu.memory_space<vmem>>, %arg5: memref<128x128xf32, #tpu.memory_space<vmem>>, %arg6: memref<1x128xf32, #tpu.memory_space<vmem>>, %arg7: memref<16x256xf32, #tpu.memory_space<vmem>>) attributes {dimension_semantics = [#tpu.dimension_semantics<parallel>], iteration_bounds = array<i64: 2>, scalar_prefetch = 0 : i64, scratch_operands = 0 : i64, tpu.core_type = #tpu.core_type<tc>, window_params = [{transform_indices = @transform_0, window_bounds = array<i64: 256, 192>}, {pipeline_mode = #tpu.pipeline_mode<synchronous>, transform_indices = @transform_1, window_bounds = array<i64: 192, 128>}, {pipeline_mode = #tpu.pipeline_mode<synchronous>, transform_indices = @transform_2, window_bounds = array<i64: 1, 128>}, {pipeline_mode = #tpu.pipeline_mode<synchronous>, transform_indices = @transform_3, window_bounds = array<i64: 16, 256>}, {pipeline_mode = #tpu.pipeline_mode<synchronous>, transform_indices = @transform_4, window_bounds = array<i64: 128, 128>}, {pipeline_mode = #tpu.pipeline_mode<synchronous>, transform_indices = @transform_5, window_bounds = array<i64: 1, 128>}, {transform_indices = @transform_6, window_bounds = array<i64: 16, 256>}]} {
    %c0 = arith.constant 0 : index
    %c0_0 = arith.constant 0 : index
    %0 = vector.load %arg1[%c0, %c0_0] : memref<256x192xf32, #tpu.memory_space<vmem>>, vector<256x192xf32>
    %c0_1 = arith.constant 0 : index
    %c0_2 = arith.constant 0 : index
    %1 = vector.load %arg2[%c0_1, %c0_2] : memref<192x128xf32, #tpu.memory_space<vmem>>, vector<192x128xf32>
    %cst = arith.constant dense<0.000000e+00> : vector<256x128xf32>
    %2 = tpu.matmul %0, %1, %cst {dimension_numbers = #tpu.dot_dimension_numbers<[1], [0], [0], [1], [0, 0, 1, 1], [], []>} : vector<256x192xf32>, vector<192x128xf32>, vector<256x128xf32> -> vector<256x128xf32>
    %c0_3 = arith.constant 0 : index
    %c0_4 = arith.constant 0 : index
    %3 = vector.load %arg3[%c0_3, %c0_4] : memref<1x128xf32, #tpu.memory_space<vmem>>, vector<1x128xf32>
    %4 = vector.broadcast %3 : vector<1x128xf32> to vector<256x128xf32>
    %5 = arith.addf %2, %4 : vector<256x128xf32>
    %cst_5 = arith.constant 0.000000e+00 : f32
    %6 = vector.broadcast %cst_5 : f32 to vector<256x128xf32>
    %7 = arith.maximumf %5, %6 : vector<256x128xf32>
    %c0_6 = arith.constant 0 : index
    %c0_7 = arith.constant 0 : index
    %8 = vector.load %arg4[%c0_6, %c0_7] : memref<16x256xf32, #tpu.memory_space<vmem>>, vector<16x256xf32>
    %cst_8 = arith.constant dense<0.000000e+00> : vector<16x128xf32>
    %9 = tpu.matmul %8, %7, %cst_8 {dimension_numbers = #tpu.dot_dimension_numbers<[1], [0], [0], [1], [0, 0, 1, 1], [], []>} : vector<16x256xf32>, vector<256x128xf32>, vector<16x128xf32> -> vector<16x128xf32>
    %c0_9 = arith.constant 0 : index
    %c0_10 = arith.constant 0 : index
    %10 = vector.load %arg5[%c0_9, %c0_10] : memref<128x128xf32, #tpu.memory_space<vmem>>, vector<128x128xf32>
    %cst_11 = arith.constant dense<0.000000e+00> : vector<16x128xf32>
    %11 = tpu.matmul %9, %10, %cst_11 {dimension_numbers = #tpu.dot_dimension_numbers<[1], [0], [0], [1], [0, 0, 1, 1], [], []>} : vector<16x128xf32>, vector<128x128xf32>, vector<16x128xf32> -> vector<16x128xf32>
    %c0_12 = arith.constant 0 : index
    %c0_13 = arith.constant 0 : index
    %12 = vector.load %arg6[%c0_12, %c0_13] : memref<1x128xf32, #tpu.memory_space<vmem>>, vector<1x128xf32>
    %13 = vector.broadcast %12 : vector<1x128xf32> to vector<16x128xf32>
    %14 = arith.addf %11, %13 : vector<16x128xf32>
    %15 = arith.negf %14 : vector<16x128xf32>
    %16 = math.exp %15 : vector<16x128xf32>
    %cst_14 = arith.constant 1.000000e+00 : f32
    %17 = vector.broadcast %cst_14 : f32 to vector<16x128xf32>
    %18 = arith.addf %17, %16 : vector<16x128xf32>
    %19 = arith.divf %17, %18 : vector<16x128xf32>
    %c0_15 = arith.constant 0 : index
    %c0_16 = arith.constant 0 : index
    %20 = vector.load %arg7[%c0_15, %c0_16] : memref<16x256xf32, #tpu.memory_space<vmem>>, vector<16x128xf32>
    tpu.vector_store %arg7[%c0_15, %c0_16], %19 {strides = array<i32>} : memref<16x256xf32, #tpu.memory_space<vmem>>, vector<16x128xf32>,
    %cst_17 = arith.constant 0.000000e+00 : f32
    %21 = vector.broadcast %cst_17 : f32 to vector<16x128xf32>
    %22 = arith.cmpf ogt, %14, %21 : vector<16x128xf32>
    %23 = arith.extui %22 : vector<16x128xi1> to vector<16x128xi32>
    %24 = arith.sitofp %23 : vector<16x128xi32> to vector<16x128xf32>
    %c0_18 = arith.constant 0 : index
    %c128 = arith.constant 128 : index
    %25 = vector.load %arg7[%c0_18, %c128] : memref<16x256xf32, #tpu.memory_space<vmem>>, vector<16x128xf32>
    tpu.vector_store %arg7[%c0_18, %c128], %24 {strides = array<i32>} : memref<16x256xf32, #tpu.memory_space<vmem>>, vector<16x128xf32>,
    return
  }
  func.func @transform_0(%arg0: i32) -> (i32, i32) {
    %c0_i32 = arith.constant 0 : i32
    %c0_i32_0 = arith.constant 0 : i32
    return %arg0, %c0_i32 : i32, i32
  }
  func.func @transform_1(%arg0: i32) -> (i32, i32) {
    %c0_i32 = arith.constant 0 : i32
    %c0_i32_0 = arith.constant 0 : i32
    %c0_i32_1 = arith.constant 0 : i32
    return %c0_i32, %c0_i32_0 : i32, i32
  }
  func.func @transform_2(%arg0: i32) -> (i32, i32) {
    %c0_i32 = arith.constant 0 : i32
    %c0_i32_0 = arith.constant 0 : i32
    %c0_i32_1 = arith.constant 0 : i32
    return %c0_i32, %c0_i32_0 : i32, i32
  }
  func.func @transform_3(%arg0: i32) -> (i32, i32) {
    %c0_i32 = arith.constant 0 : i32
    %c0_i32_0 = arith.constant 0 : i32
    %c0_i32_1 = arith.constant 0 : i32
    return %c0_i32, %c0_i32_0 : i32, i32
  }
  func.func @transform_4(%arg0: i32) -> (i32, i32) {
    %c0_i32 = arith.constant 0 : i32
    %c0_i32_0 = arith.constant 0 : i32
    %c0_i32_1 = arith.constant 0 : i32
    return %c0_i32, %c0_i32_0 : i32, i32
  }
  func.func @transform_5(%arg0: i32) -> (i32, i32) {
    %c0_i32 = arith.constant 0 : i32
    %c0_i32_0 = arith.constant 0 : i32
    %c0_i32_1 = arith.constant 0 : i32
    return %c0_i32, %c0_i32_0 : i32, i32
  }
  func.func @transform_6(%arg0: i32) -> (i32, i32) {
    %c0_i32 = arith.constant 0 : i32
    %c0_i32_0 = arith.constant 0 : i32
    return %arg0, %c0_i32 : i32, i32
  }
}

</mosaic_0001>

<bundles_post_ra>
// kernel: tagging_forward.1
= control target key start
LH: loop header
LB: loop body
LE: loop exit
PB: predicated region body
PF: predicated region fallthrough
CT: control target
= control target key end

     0   :  { %s1297_s21 = smov 0   ;;  %s1642_s0 = inlined_call_operand.vmem [shape: f32[512,192], index: 0, kind: input, shape index: {}]   ;;  %s1643_s1 = inlined_call_operand.vmem [shape: f32[192,128], index: 1, kind: input, shape index: {}]   ;;  %s1644_s2 = inlined_call_operand.vmem [shape: f32[1,128], index: 2, kind: input, shape index: {}]   ;;  %s1645_s3 = inlined_call_operand.vmem [shape: f32[16,256], index: 3, kind: input, shape index: {}]   ;;  %s1646_s4 = inlined_call_operand.vmem [shape: f32[128,128], index: 4, kind: input, shape index: {}]   ;;  %s1647_s5 = inlined_call_operand.vmem [shape: f32[1,128], index: 5, kind: input, shape index: {}]   ;;  %s1648_s6 = inlined_call_operand.vmem [shape: f32[32,256], index: 6, kind: output, shape index: {}]  }
   0x1 LB: > { %s966_s22 = sadd.s32 4294967295, %s1258_s21   ;;  %p970_p0 = scmp.ge.s32.totalorder %s1258_s21, 1  ;;  %s1258_s21 = sphi %s1297_s21, %s16_s21  }
   0x2   : > { %p214_p1 = scmp.lt.s32.totalorder %s1258_s21, 3 }
   0x4   : > { %p215_p2 = pnand %p970_p0, %p214_p1 }
   0x5   : > { %v324_v0 = vld [vmem:[%s1643_s1] sm:$0xff] (!%p215_p2)  ;;  %v325_v1 = vld [vmem:[%s1643_s1 + $0x8] sm:$0xff] (!%p215_p2)  ;;  %v326_v2 = vld [vmem:[%s1643_s1 + $0x10] sm:$0xff] (!%p215_p2)  ;;  %s971_s29 = sshll.u32 (!%p215_p2), %s966_s22, 5  ;;  %v1260_v3 = vmov (!%p215_p2), 0.0|0.0   ;;  %vm355_vm0 = vcmask (!%p215_p2), 523264  }
   0x6   : > { %218 = sbr.rel (%p215_p2) target bundleno = 839 (0x347), region = 44  ;;  %1110 = vmatprep.subr.bf16.mxu0 (!%p215_p2), %v1260_v3  ;;  %v1111_v4 = vpack.c.bf16 (!%p215_p2), %v325_v1, %v324_v0  ;;  %v327_v5 = vld [vmem:[%s1643_s1 + $0x18] sm:$0xff] (!%p215_p2)  ;;  %p247_p3 = scmp.lt.s32.totalorder (!%p215_p2), %s971_s29, 63  ;;  %1210 = vmatprep.subr.bf16.mxu1 (!%p215_p2), %v1260_v3  ;;  %v328_v7 = vld [vmem:[%s1643_s1 + $0x20] sm:$0xff] (!%p215_p2)  ;;  %v329_v8 = vld [vmem:[%s1643_s1 + $0x28] sm:$0xff] (!%p215_p2) }
   0x7   : > { %v1114_v6 = vpack.c.bf16 (!%p215_p2), %v327_v5, %v326_v2  ;;  %v1117_v9 = vpack.c.bf16 (!%p215_p2), %v329_v8, %v328_v7  ;;  %v330_v10 = vld [vmem:[%s1643_s1 + $0x30] sm:$0xff] (!%p215_p2)  ;;  %v331_v11 = vld [vmem:[%s1643_s1 + $0x38] sm:$0xff] (!%p215_p2)  ;;  %v332_v14 = vld [vmem:[%s1643_s1 + $0x40] sm:$0xff] (!%p215_p2)  ;;  %s974_s7 = sshll.u32 (!%p215_p2), %s966_s22, 1 }
   0x8   : > { %1112 = vmatpush1.bf16.msra.mxu0 (!%p215_p2), %v1111_v4  ;;  %1222 = vmatpush1.bf16.msra.mxu1 (!%p215_p2), %v1111_v4  ;;  %v1120_v13 = vpack.c.bf16 (!%p215_p2), %v331_v11, %v330_v10  ;;  %v333_v15 = vld [vmem:[%s1643_s1 + $0x48] sm:$0xff] (!%p215_p2)  ;;  %v334_v17 = vld [vmem:[%s1643_s1 + $0x50] sm:$0xff] (!%p215_p2)  ;;  %v335_v18 = vld [vmem:[%s1643_s1 + $0x58] sm:$0xff] (!%p215_p2)  ;;  %p254_p4 = scmp.lt.s32.totalorder (!%p215_p2), %s974_s7, 3 }
   0x9   : > { %1113 = vmatprep.subr.bf16.mxu0 (!%p215_p2), %v1260_v3  ;;  %1211 = vmatprep.subr.bf16.mxu1 (!%p215_p2), %v1260_v3  ;;  %v1123_v16 = vpack.c.bf16 (!%p215_p2), %v333_v15, %v332_v14  ;;  %v1126_v20 = vpack.c.bf16 (!%p215_p2), %v335_v18, %v334_v17  ;;  %v336_v21 = vld [vmem:[%s1643_s1 + $0x60] sm:$0xff] (!%p215_p2)  ;;  %v337_v22 = vld [vmem:[%s1643_s1 + $0x68] sm:$0xff] (!%p215_p2)  ;;  %v338_v24 = vld [vmem:[%s1643_s1 + $0x70] sm:$0xff] (!%p215_p2) }
   0xa   : > { %v1129_v23 = vpack.c.bf16 (!%p215_p2), %v337_v22, %v336_v21  ;;  %v339_v25 = vld [vmem:[%s1643_s1 + $0x78] sm:$0xff] (!%p215_p2)  ;;  %v340_v27 = vld [vmem:[%s1643_s1 + $0x80] sm:$0xff] (!%p215_p2)  ;;  %v341_v28 = vld [vmem:[%s1643_s1 + $0x88] sm:$0xff] (!%p215_p2) }
   0xb   : > { %v1132_v26 = vpack.c.bf16 (!%p215_p2), %v339_v25, %v338_v24  ;;  %v1135_v29 = vpack.c.bf16 (!%p215_p2), %v341_v28, %v340_v27  ;;  %v342_v30 = vld [vmem:[%s1643_s1 + $0x90] sm:$0xff] (!%p215_p2)  ;;  %v343_v31 = vld [vmem:[%s1643_s1 + $0x98] sm:$0xff] (!%p215_p2)  ;;  %v344_v33 = vld [vmem:[%s1643_s1 + $0xa0] sm:$0xff] (!%p215_p2) }
   0xc   : > { %1115 = vmatpush1.bf16.msra.mxu0 (!%p215_p2), %v1114_v6  ;;  %1223 = vmatpush1.bf16.msra.mxu1 (!%p215_p2), %v1114_v6  ;;  %v1138_v32 = vpack.c.bf16 (!%p215_p2), %v343_v31, %v342_v30  ;;  %v345_v34 = vld [vmem:[%s1643_s1 + $0xa8] sm:$0xff] (!%p215_p2)  ;;  %v346_v36 = vld [vmem:[%s1643_s1 + $0xb0] sm:$0xff] (!%p215_p2)  ;;  %v347_v37 = vld [vmem:[%s1643_s1 + $0xb8] sm:$0xff] (!%p215_p2) }
   0xd   : > { %s1650_s29 = smov (!%p247_p3, %s971_s29), 63  ;;  %1116 = vmatprep.subr.bf16.mxu0 %v1260_v3  ;;  %1212 = vmatprep.subr.bf16.mxu1 %v1260_v3  ;;  %v1141_v35 = vpack.c.bf16 %v345_v34, %v344_v33  ;;  %v1144_v38 = vpack.c.bf16 %v347_v37, %v346_v36  ;;  %v710_v37 = vld [vmem:[%s1645_s3 + $0x8] sm:$0xff]  ;;  %s1652_s7 = smov (!%p254_p4, %s974_s7), 3 }
   0xe   : > { %s1017_s12 = sshll.u32 %s1650_s29, 4  ;;  %s1018_s10 = sshll.u32 %s1652_s7, 4 }
   0xf   : > { %s1332_s15 = scalar_lea.vmem %s1642_s0, %s1017_s12 }
  0x10   : > { %v261_v12 = vld [vmem:[%s1332_s15 + $0x8] sm:$0xff]  ;;  %1118 = vmatpush1.bf16.msra.mxu0 %v1117_v9  ;;  %1224 = vmatpush1.bf16.msra.mxu1 %v1117_v9  ;;  %v303_v19 = vld [vmem:[%s1332_s15 + $0x158] sm:$0xff]  ;;  %v260_v39 = vld [vmem:[%s1332_s15] sm:$0xff] }
  0x11   : > { %978 = vmatprep.mubr.msk.f32.mxu0 %vm355_vm0, %v261_v12  ;;  %1119 = vmatprep.subr.bf16.mxu0 %v1260_v3  ;;  %v302_v40 = vld [vmem:[%s1332_s15 + $0x150] sm:$0xff]  ;;  %v263_v41 = vld [vmem:[%s1332_s15 + $0x18] sm:$0xff]  ;;  %v305_v42 = vld [vmem:[%s1332_s15 + $0x168] sm:$0xff] }
  0x12   : > { %1213 = vmatprep.subr.bf16.mxu1 %v1260_v3  ;;  %999 = vmatprep.mubr.msk.f32.mxu1 %vm355_vm0, %v303_v19  ;;  %v262_v43 = vld [vmem:[%s1332_s15 + $0x10] sm:$0xff]  ;;  %v304_v44 = vld [vmem:[%s1332_s15 + $0x160] sm:$0xff]  ;;  %v265_v45 = vld [vmem:[%s1332_s15 + $0x28] sm:$0xff] }
  0x13   : > { %v307_v46 = vld [vmem:[%s1332_s15 + $0x178] sm:$0xff]  ;;  %v264_v47 = vld [vmem:[%s1332_s15 + $0x20] sm:$0xff]  ;;  %v306_v48 = vld [vmem:[%s1332_s15 + $0x170] sm:$0xff] }
  0x14   : > { %1121 = vmatpush1.bf16.msra.mxu0 %v1120_v13  ;;  %1225 = vmatpush1.bf16.msra.mxu1 %v1120_v13  ;;  %v267_v49 = vld [vmem:[%s1332_s15 + $0x38] sm:$0xff]  ;;  %v309_v50 = vld [vmem:[%s1332_s15 + $0x188] sm:$0xff]  ;;  %v266_v51 = vld [vmem:[%s1332_s15 + $0x30] sm:$0xff] }
  0x15   : > { %1122 = vmatprep.subr.bf16.mxu0 %v1260_v3  ;;  %1214 = vmatprep.subr.bf16.mxu1 %v1260_v3  ;;  %v308_v52 = vld [vmem:[%s1332_s15 + $0x180] sm:$0xff]  ;;  %v269_v53 = vld [vmem:[%s1332_s15 + $0x48] sm:$0xff]  ;;  %v311_v54 = vld [vmem:[%s1332_s15 + $0x198] sm:$0xff] }
  0x16   : > { %v268_v55 = vld [vmem:[%s1332_s15 + $0x40] sm:$0xff]  ;;  %v310_v56 = vld [vmem:[%s1332_s15 + $0x190] sm:$0xff]  ;;  %v271_v57 = vld [vmem:[%s1332_s15 + $0x58] sm:$0xff] }
  0x17   : > { %v313_v58 = vld [vmem:[%s1332_s15 + $0x1a8] sm:$0xff]  ;;  %v270_v59 = vld [vmem:[%s1332_s15 + $0x50] sm:$0xff]  ;;  %v312_v60 = vld [vmem:[%s1332_s15 + $0x1a0] sm:$0xff] }
  0x18   : > { %1124 = vmatpush1.bf16.msra.mxu0 %v1123_v16  ;;  %1226 = vmatpush1.bf16.msra.mxu1 %v1123_v16  ;;  %v273_v61 = vld [vmem:[%s1332_s15 + $0x68] sm:$0xff]  ;;  %v315_v62 = vld [vmem:[%s1332_s15 + $0x1b8] sm:$0xff]  ;;  %v272_v63 = vld [vmem:[%s1332_s15 + $0x60] sm:$0xff] }
  0x19   : > { %1125 = vmatprep.subr.bf16.mxu0 %v1260_v3  ;;  %1215 = vmatprep.subr.bf16.mxu1 %v1260_v3  ;;  %v314_v0 = vld [vmem:[%s1332_s15 + $0x1b0] sm:$0xff]  ;;  %v275_v1 = vld [vmem:[%s1332_s15 + $0x78] sm:$0xff]  ;;  %v317_v2 = vld [vmem:[%s1332_s15 + $0x1c8] sm:$0xff] }
  0x1a   : > { %v316_v4 = vld [vmem:[%s1332_s15 + $0x1c0] sm:$0xff]  ;;  %v277_v5 = vld [vmem:[%s1332_s15 + $0x88] sm:$0xff]  ;;  %v319_v6 = vld [vmem:[%s1332_s15 + $0x1d8] sm:$0xff] }
  0x1b   : > { %v276_v7 = vld [vmem:[%s1332_s15 + $0x80] sm:$0xff]  ;;  %v318_v8 = vld [vmem:[%s1332_s15 + $0x1d0] sm:$0xff]  ;;  %v279_v9 = vld [vmem:[%s1332_s15 + $0x98] sm:$0xff] }
  0x1c   : > { %1127 = vmatpush1.bf16.msra.mxu0 %v1126_v20  ;;  %1227 = vmatpush1.bf16.msra.mxu1 %v1126_v20  ;;  %v321_v10 = vld [vmem:[%s1332_s15 + $0x1e8] sm:$0xff]  ;;  %v278_v11 = vld [vmem:[%s1332_s15 + $0x90] sm:$0xff]  ;;  %v320_v12 = vld [vmem:[%s1332_s15 + $0x1e0] sm:$0xff] }
  0x1d   : > { %1128 = vmatprep.subr.bf16.mxu0 %v1260_v3  ;;  %1216 = vmatprep.subr.bf16.mxu1 %v1260_v3  ;;  %v281_v13 = vld [vmem:[%s1332_s15 + $0xa8] sm:$0xff]  ;;  %v323_v14 = vld [vmem:[%s1332_s15 + $0x1f8] sm:$0xff]  ;;  %v280_v15 = vld [vmem:[%s1332_s15 + $0xa0] sm:$0xff] }
  0x1e   : > { %v322_v16 = vld [vmem:[%s1332_s15 + $0x1f0] sm:$0xff]  ;;  %v283_v17 = vld [vmem:[%s1332_s15 + $0xb8] sm:$0xff]  ;;  %v285_v19 = vld [vmem:[%s1332_s15 + $0xc8] sm:$0xff] }
  0x1f   : > { %v282_v18 = vld [vmem:[%s1332_s15 + $0xb0] sm:$0xff]  ;;  %v284_v20 = vld [vmem:[%s1332_s15 + $0xc0] sm:$0xff]  ;;  %v287_v21 = vld [vmem:[%s1332_s15 + $0xd8] sm:$0xff] }
  0x20   : > { %1130 = vmatpush1.bf16.msra.mxu0 %v1129_v23  ;;  %1228 = vmatpush1.bf16.msra.mxu1 %v1129_v23  ;;  %v286_v22 = vld [vmem:[%s1332_s15 + $0xd0] sm:$0xff]  ;;  %v289_v23 = vld [vmem:[%s1332_s15 + $0xe8] sm:$0xff]  ;;  %v288_v24 = vld [vmem:[%s1332_s15 + $0xe0] sm:$0xff] }
  0x21   : > { %1131 = vmatprep.subr.bf16.mxu0 %v1260_v3  ;;  %1217 = vmatprep.subr.bf16.mxu1 %v1260_v3  ;;  %v291_v25 = vld [vmem:[%s1332_s15 + $0xf8] sm:$0xff]  ;;  %v293_v27 = vld [vmem:[%s1332_s15 + $0x108] sm:$0xff]  ;;  %v292_v28 = vld [vmem:[%s1332_s15 + $0x100] sm:$0xff] }
  0x22   : > { %v294_v30 = vld [vmem:[%s1332_s15 + $0x110] sm:$0xff]  ;;  %v297_v31 = vld [vmem:[%s1332_s15 + $0x128] sm:$0xff]  ;;  %v299_v33 = vld [vmem:[%s1332_s15 + $0x138] sm:$0xff] }
  0x23   : > { %v298_v34 = vld [vmem:[%s1332_s15 + $0x130] sm:$0xff]  ;;  %v300_v36 = vld [vmem:[%s1332_s15 + $0x140] sm:$0xff] }
  0x24   : > { %1133 = vmatpush1.bf16.msra.mxu0 %v1132_v26  ;;  %1229 = vmatpush1.bf16.msra.mxu1 %v1132_v26  ;;  %v290_v26 = vld [vmem:[%s1332_s15 + $0xf0] sm:$0xff] }
  0x25   : > { %1134 = vmatprep.subr.bf16.mxu0 %v1260_v3  ;;  %1218 = vmatprep.subr.bf16.mxu1 %v1260_v3 }
  0x28   : > { %1136 = vmatpush1.bf16.msra.mxu0 %v1135_v29  ;;  %1230 = vmatpush1.bf16.msra.mxu1 %v1135_v29  ;;  %v295_v29 = vld [vmem:[%s1332_s15 + $0x118] sm:$0xff] }
  0x29   : > { %1137 = vmatprep.subr.bf16.mxu0 %v1260_v3  ;;  %1219 = vmatprep.subr.bf16.mxu1 %v1260_v3 }
  0x2c   : > { %1139 = vmatpush1.bf16.msra.mxu0 %v1138_v32  ;;  %1231 = vmatpush1.bf16.msra.mxu1 %v1138_v32  ;;  %v296_v32 = vld [vmem:[%s1332_s15 + $0x120] sm:$0xff] }
  0x2d   : > { %1140 = vmatprep.subr.bf16.mxu0 %v1260_v3  ;;  %1220 = vmatprep.subr.bf16.mxu1 %v1260_v3 }
  0x30   : > { %1142 = vmatpush1.bf16.msra.mxu0 %v1141_v35  ;;  %1232 = vmatpush1.bf16.msra.mxu1 %v1141_v35  ;;  %v301_v35 = vld [vmem:[%s1332_s15 + $0x148] sm:$0xff] }
  0x31   : > { %1143 = vmatprep.subr.bf16.mxu0 %v1260_v3  ;;  %1221 = vmatprep.subr.bf16.mxu1 %v1260_v3  ;;  %v274_v3 = vld [vmem:[%s1332_s15 + $0x70] sm:$0xff]  ;;  %s258_s15 = scalar_lea.vmem %s1648_s6, %s1018_s10 }
  0x34   : > { %1145 = vmatpush1.bf16.msra.mxu0 %v1144_v38  ;;  %1233 = vmatpush1.bf16.msra.mxu1 %v1144_v38  ;;  %v1510_v38 = vld [vmem:[%s1644_s2] ss:$0 sm:$0xff] }
  0x37   : > { %517 = vmatmul.mubr.f32.vlgmr.msra.gmra.mrb[0].mxu0 %v260_v39  ;;  %622 = vmatmul.mubr.f32.vlgmr.msra.gmra.mrb[0].mxu1 %v302_v40 }
  0x38   : > { %979 = vmatprep.mubr.msk.f32.mxu0 %vm355_vm0, %v263_v41  ;;  %1000 = vmatprep.mubr.msk.f32.mxu1 %vm355_vm0, %v305_v42 }
  0x3b   : > { %522 = vmatmul.mubr.f32.gmra.mrb[2].mxu0 %v262_v43  ;;  %627 = vmatmul.mubr.f32.gmra.mrb[2].mxu1 %v304_v44 }
  0x3c   : > { %980 = vmatprep.mubr.msk.f32.mxu0 %vm355_vm0, %v265_v45  ;;  %1001 = vmatprep.mubr.msk.f32.mxu1 %vm355_vm0, %v307_v46 }
  0x3f   : > { %527 = vmatmul.mubr.f32.gmra.mrb[4].mxu0 %v264_v47  ;;  %632 = vmatmul.mubr.f32.gmra.mrb[4].mxu1 %v306_v48 }
  0x40   : > { %981 = vmatprep.mubr.msk.f32.mxu0 %vm355_vm0, %v267_v49  ;;  %1002 = vmatprep.mubr.msk.f32.mxu1 %vm355_vm0, %v309_v50 }
  0x43   : > { %532 = vmatmul.mubr.f32.gmra.mrb[6].mxu0 %v266_v51  ;;  %637 = vmatmul.mubr.f32.gmra.mrb[6].mxu1 %v308_v52 }
  0x44   : > { %982 = vmatprep.mubr.msk.f32.mxu0 %vm355_vm0, %v269_v53  ;;  %1003 = vmatprep.mubr.msk.f32.mxu1 %vm355_vm0, %v311_v54 }
  0x47   : > { %537 = vmatmul.mubr.f32.gmra.mrb[8].mxu0 %v268_v55  ;;  %642 = vmatmul.mubr.f32.gmra.mrb[8].mxu1 %v310_v56 }
  0x48   : > { %983 = vmatprep.mubr.msk.f32.mxu0 %vm355_vm0, %v271_v57  ;;  %1004 = vmatprep.mubr.msk.f32.mxu1 %vm355_vm0, %v313_v58 }
  0x4b   : > { %542 = vmatmul.mubr.f32.gmra.mrb[10].mxu0 %v270_v59  ;;  %647 = vmatmul.mubr.f32.gmra.mrb[10].mxu1 %v312_v60 }
  0x4c   : > { %984 = vmatprep.mubr.msk.f32.mxu0 %vm355_vm0, %v273_v61  ;;  %1005 = vmatprep.mubr.msk.f32.mxu1 %vm355_vm0, %v315_v62 }
  0x4f   : > { %547 = vmatmul.mubr.f32.gmra.mrb[12].mxu0 %v272_v63  ;;  %652 = vmatmul.mubr.f32.gmra.mrb[12].mxu1 %v314_v0 }
  0x50   : > { %985 = vmatprep.mubr.msk.f32.mxu0 %vm355_vm0, %v275_v1  ;;  %1006 = vmatprep.mubr.msk.f32.mxu1 %vm355_vm0, %v317_v2 }
  0x53   : > { %552 = vmatmul.mubr.f32.gmra.mrb[14].mxu0 %v274_v3  ;;  %657 = vmatmul.mubr.f32.gmra.mrb[14].mxu1 %v316_v4 }
  0x54   : > { %986 = vmatprep.mubr.msk.f32.mxu0 %vm355_vm0, %v277_v5  ;;  %1007 = vmatprep.mubr.msk.f32.mxu1 %vm355_vm0, %v319_v6 }
  0x57   : > { %557 = vmatmul.mubr.f32.gmra.mrb[16].mxu0 %v276_v7  ;;  %662 = vmatmul.mubr.f32.gmra.mrb[16].mxu1 %v318_v8 }
  0x58   : > { %987 = vmatprep.mubr.msk.f32.mxu0 %vm355_vm0, %v279_v9  ;;  %1008 = vmatprep.mubr.msk.f32.mxu1 %vm355_vm0, %v321_v10 }
  0x5b   : > { %562 = vmatmul.mubr.f32.gmra.mrb[18].mxu0 %v278_v11  ;;  %667 = vmatmul.mubr.f32.gmra.mrb[18].mxu1 %v320_v12 }
  0x5c   : > { %988 = vmatprep.mubr.msk.f32.mxu0 %vm355_vm0, %v281_v13  ;;  %1009 = vmatprep.mubr.msk.f32.mxu1 %vm355_vm0, %v323_v14 }
  0x5f   : > { %567 = vmatmul.mubr.f32.gmra.mrb[20].mxu0 %v280_v15  ;;  %672 = vmatmul.mubr.f32.gmra.mrb[20].mxu1 %v322_v16 }
  0x60   : > { %989 = vmatprep.mubr.msk.f32.mxu0 %vm355_vm0, %v283_v17  ;;  %777 = vmatprep.mubr.f32.mxu1 %v710_v37 }
  0x63   : > { %572 = vmatmul.mubr.f32.gmra.mrb[22].mxu0 %v282_v18 }
  0x64   : > { %990 = vmatprep.mubr.msk.f32.mxu0 %vm355_vm0, %v285_v19 }
  0x67   : > { %577 = vmatmul.mubr.f32.gmra.mrb[24].mxu0 %v284_v20 }
  0x68   : > { %991 = vmatprep.mubr.msk.f32.mxu0 %vm355_vm0, %v287_v21 }
  0x6b   : > { %582 = vmatmul.mubr.f32.gmra.mrb[26].mxu0 %v286_v22 }
  0x6c   : > { %992 = vmatprep.mubr.msk.f32.mxu0 %vm355_vm0, %v289_v23 }
  0x6f   : > { %587 = vmatmul.mubr.f32.gmra.mrb[28].mxu0 %v288_v24 }
  0x70   : > { %993 = vmatprep.mubr.msk.f32.mxu0 %vm355_vm0, %v291_v25 }
  0x73   : > { %592 = vmatmul.mubr.f32.gmra.mrb[30].mxu0 %v290_v26 }
  0x74   : > { %994 = vmatprep.mubr.msk.f32.mxu0 %vm355_vm0, %v293_v27 }
  0x77   : > { %597 = vmatmul.mubr.f32.gmra.mrb[32].mxu0 %v292_v28 }
  0x78   : > { %995 = vmatprep.mubr.msk.f32.mxu0 %vm355_vm0, %v295_v29 }
  0x7b   : > { %602 = vmatmul.mubr.f32.gmra.mrb[34].mxu0 %v294_v30 }
  0x7c   : > { %996 = vmatprep.mubr.msk.f32.mxu0 %vm355_vm0, %v297_v31 }
  0x7f   : > { %607 = vmatmul.mubr.f32.gmra.mrb[36].mxu0 %v296_v32 }
  0x80   : > { %997 = vmatprep.mubr.msk.f32.mxu0 %vm355_vm0, %v299_v33 }
  0x83   : > { %612 = vmatmul.mubr.f32.gmra.mrb[38].mxu0 %v298_v34 }
  0x84   : > { %998 = vmatprep.mubr.msk.f32.mxu0 %vm355_vm0, %v301_v35 }
  0x87   : > { %617 = vmatmul.mubr.f32.gmra.mrb[40].mxu0 %v300_v36 }
 0x10a   : > { %v518_v39 = vpop.f32.mrb[0].mxu0  ;;  %v1512_v40 = vpop.f32.mrb[0].mxu1 }
 0x10b   : > { %v520_v41 = vpop.f32.mrb[1].mxu0  ;;  %v625_v42 = vpop.f32.mrb[1].mxu1  ;;  %v519_v43 = vadd.f32 %v1510_v38, %v518_v39 }
 0x10d   : > { %v677_v50 = vmax.f32 %v519_v43, 0.0 }
 0x10e   : > { %v523_v44 = vpop.f32.mrb[2].mxu0  ;;  %v628_v45 = vpop.f32.mrb[2].mxu1 }
 0x10f   : > { %v524_v46 = vadd.f32 %v1510_v38, %v523_v44  ;;  %v525_v47 = vpop.f32.mrb[3].mxu0  ;;  %v629_v48 = vadd.f32 %v1510_v38, %v628_v45  ;;  %v630_v49 = vpop.f32.mrb[3].mxu1 }
 0x111   : > { %v678_v51 = vmax.f32 %v524_v46, 0.0  ;;  %v699_v56 = vmax.f32 %v629_v48, 0.0 }
 0x112   : > { %v528_v52 = vpop.f32.mrb[4].mxu0  ;;  %v633_v53 = vpop.f32.mrb[4].mxu1 }
 0x113   : > { %v1517_v54 = vpack.c.bf16 %v678_v51, %v677_v50  ;;  %v530_v55 = vpop.f32.mrb[5].mxu0  ;;  %v634_v57 = vadd.f32 %v1510_v38, %v633_v53  ;;  %v635_v58 = vpop.f32.mrb[5].mxu1  ;;  %v529_v59 = vadd.f32 %v1510_v38, %v528_v52 }
 0x115   : > { %v700_v60 = vmax.f32 %v634_v57, 0.0  ;;  %v679_v4 = vmax.f32 %v529_v59, 0.0 }
 0x116   : > { %v533_v61 = vpop.f32.mrb[6].mxu0  ;;  %v638_v62 = vpop.f32.mrb[6].mxu1 }
 0x117   : > { %v534_v63 = vadd.f32 %v1510_v38, %v533_v61  ;;  %v535_v0 = vpop.f32.mrb[7].mxu0  ;;  %v1522_v1 = vpack.c.bf16 %v700_v60, %v699_v56  ;;  %v639_v2 = vadd.f32 %v1510_v38, %v638_v62  ;;  %v640_v3 = vpop.f32.mrb[7].mxu1 }
 0x119   : > { %v680_v5 = vmax.f32 %v534_v63, 0.0  ;;  %v701_v10 = vmax.f32 %v639_v2, 0.0 }
 0x11a   : > { %v538_v6 = vpop.f32.mrb[8].mxu0  ;;  %v643_v7 = vpop.f32.mrb[8].mxu1 }
 0x11b   : > { %v1525_v8 = vpack.c.bf16 %v680_v5, %v679_v4  ;;  %v540_v9 = vpop.f32.mrb[9].mxu0  ;;  %v644_v11 = vadd.f32 %v1510_v38, %v643_v7  ;;  %v645_v12 = vpop.f32.mrb[9].mxu1  ;;  %v539_v13 = vadd.f32 %v1510_v38, %v538_v6 }
 0x11d   : > { %v702_v14 = vmax.f32 %v644_v11, 0.0  ;;  %v681_v22 = vmax.f32 %v539_v13, 0.0 }
 0x11e   : > { %v543_v15 = vpop.f32.mrb[10].mxu0  ;;  %v648_v16 = vpop.f32.mrb[10].mxu1 }
 0x11f   : > { %v544_v17 = vadd.f32 %v1510_v38, %v543_v15  ;;  %v545_v18 = vpop.f32.mrb[11].mxu0  ;;  %v1530_v19 = vpack.c.bf16 %v702_v14, %v701_v10  ;;  %v649_v20 = vadd.f32 %v1510_v38, %v648_v16  ;;  %v650_v21 = vpop.f32.mrb[11].mxu1 }
 0x121   : > { %v682_v23 = vmax.f32 %v544_v17, 0.0  ;;  %v703_v28 = vmax.f32 %v649_v20, 0.0 }
 0x122   : > { %v548_v24 = vpop.f32.mrb[12].mxu0  ;;  %v653_v25 = vpop.f32.mrb[12].mxu1 }
 0x123   : > { %v1533_v26 = vpack.c.bf16 %v682_v23, %v681_v22  ;;  %v550_v27 = vpop.f32.mrb[13].mxu0  ;;  %v654_v29 = vadd.f32 %v1510_v38, %v653_v25  ;;  %v655_v30 = vpop.f32.mrb[13].mxu1  ;;  %v549_v31 = vadd.f32 %v1510_v38, %v548_v24 }
 0x125   : > { %v704_v32 = vmax.f32 %v654_v29, 0.0  ;;  %v683_v42 = vmax.f32 %v549_v31, 0.0 }
 0x126   : > { %v553_v33 = vpop.f32.mrb[14].mxu0  ;;  %v658_v34 = vpop.f32.mrb[14].mxu1 }
 0x127   : > { %v554_v35 = vadd.f32 %v1510_v38, %v553_v33  ;;  %v555_v36 = vpop.f32.mrb[15].mxu0  ;;  %v1538_v37 = vpack.c.bf16 %v704_v32, %v703_v28  ;;  %v659_v39 = vadd.f32 %v1510_v38, %v658_v34  ;;  %v660_v41 = vpop.f32.mrb[15].mxu1 }
 0x129   : > { %v684_v43 = vmax.f32 %v554_v35, 0.0  ;;  %v705_v48 = vmax.f32 %v659_v39, 0.0 }
 0x12a   : > { %v558_v44 = vpop.f32.mrb[16].mxu0  ;;  %v663_v45 = vpop.f32.mrb[16].mxu1 }
 0x12b   : > { %v1541_v46 = vpack.c.bf16 %v684_v43, %v683_v42  ;;  %v560_v47 = vpop.f32.mrb[17].mxu0  ;;  %v664_v49 = vadd.f32 %v1510_v38, %v663_v45  ;;  %v665_v50 = vpop.f32.mrb[17].mxu1  ;;  %v559_v51 = vadd.f32 %v1510_v38, %v558_v44 }
 0x12d   : > { %v706_v52 = vmax.f32 %v664_v49, 0.0  ;;  %v685_v61 = vmax.f32 %v559_v51, 0.0 }
 0x12e   : > { %v563_v53 = vpop.f32.mrb[18].mxu0  ;;  %v668_v55 = vpop.f32.mrb[18].mxu1 }
 0x12f   : > { %v564_v56 = vadd.f32 %v1510_v38, %v563_v53  ;;  %v565_v57 = vpop.f32.mrb[19].mxu0  ;;  %v1546_v58 = vpack.c.bf16 %v706_v52, %v705_v48  ;;  %v669_v59 = vadd.f32 %v1510_v38, %v668_v55  ;;  %v670_v60 = vpop.f32.mrb[19].mxu1 }
 0x130   : > { %v624_v57 = vadd.f32 %v1510_v38, %v1512_v40  ;;  %v789_v40 = vld [vmem:[%s1646_s4 + $0x8] sm:$0xff] }
 0x131   : > { %v686_v62 = vmax.f32 %v564_v56, 0.0  ;;  %v707_v4 = vmax.f32 %v669_v59, 0.0 }
 0x132   : > { %v568_v63 = vpop.f32.mrb[20].mxu0  ;;  %v673_v0 = vpop.f32.mrb[20].mxu1 }
 0x133   : > { %v1549_v2 = vpack.c.bf16 %v686_v62, %v685_v61  ;;  %v570_v3 = vpop.f32.mrb[21].mxu0  ;;  %v674_v5 = vadd.f32 %v1510_v38, %v673_v0  ;;  %v675_v6 = vpop.f32.mrb[21].mxu1  ;;  %v569_v7 = vadd.f32 %v1510_v38, %v568_v63 }
 0x134   : > { %v698_v3 = vmax.f32 %v624_v57, 0.0 }
 0x135   : > { %v708_v9 = vmax.f32 %v674_v5, 0.0  ;;  %v687_v14 = vmax.f32 %v569_v7, 0.0  ;;  %v794_v7 = vld [vmem:[%s1646_s4 + $0x30] sm:$0xff] }
 0x136   : > { %v573_v10 = vpop.f32.mrb[22].mxu0 }
 0x137   : > { %v574_v11 = vadd.f32 %v1510_v38, %v573_v10  ;;  %v575_v12 = vpop.f32.mrb[23].mxu0  ;;  %v1174_v13 = vpack.c.bf16 %v708_v9, %v707_v4  ;;  %v795_v9 = vld [vmem:[%s1646_s4 + $0x38] sm:$0xff] }
 0x138   : > { %v1190_v10 = vpack.c.bf16 %v795_v9, %v794_v7  ;;  %v797_v12 = vld [vmem:[%s1646_s4 + $0x48] sm:$0xff] }
 0x139   : > { %v688_v15 = vmax.f32 %v574_v11, 0.0  ;;  %v796_v11 = vld [vmem:[%s1646_s4 + $0x40] sm:$0xff] }
 0x13a   : > { %v578_v16 = vpop.f32.mrb[24].mxu0 }
 0x13b   : > { %v1168_v17 = vpack.c.bf16 %v688_v15, %v687_v14  ;;  %v580_v18 = vpop.f32.mrb[25].mxu0  ;;  %v579_v20 = vadd.f32 %v1510_v38, %v578_v16  ;;  %v798_v14 = vld [vmem:[%s1646_s4 + $0x50] sm:$0xff]  ;;  %v799_v15 = vld [vmem:[%s1646_s4 + $0x58] sm:$0xff] }
 0x13c   : > { %v1198_v16 = vpack.c.bf16 %v799_v15, %v798_v14  ;;  %v801_v18 = vld [vmem:[%s1646_s4 + $0x68] sm:$0xff] }
 0x13d   : > { %v689_v24 = vmax.f32 %v579_v20, 0.0 }
 0x13e   : > { %v583_v21 = vpop.f32.mrb[26].mxu0 }
 0x13f   : > { %v584_v22 = vadd.f32 %v1510_v38, %v583_v21  ;;  %v585_v23 = vpop.f32.mrb[27].mxu0  ;;  %v802_v21 = vld [vmem:[%s1646_s4 + $0x70] sm:$0xff] }
 0x141   : > { %v690_v25 = vmax.f32 %v584_v22, 0.0  ;;  %v803_v22 = vld [vmem:[%s1646_s4 + $0x78] sm:$0xff] }
 0x142   : > { %v588_v27 = vpop.f32.mrb[28].mxu0  ;;  %v1206_v23 = vpack.c.bf16 %v803_v22, %v802_v21 }
 0x143   : > { %v1172_v28 = vpack.c.bf16 %v690_v25, %v689_v24  ;;  %v590_v29 = vpop.f32.mrb[29].mxu0  ;;  %v589_v30 = vadd.f32 %v1510_v38, %v588_v27 }
 0x145   : > { %v691_v34 = vmax.f32 %v589_v30, 0.0 }
 0x146   : > { %v593_v31 = vpop.f32.mrb[30].mxu0 }
 0x147   : > { %v594_v32 = vadd.f32 %v1510_v38, %v593_v31  ;;  %v595_v33 = vpop.f32.mrb[31].mxu0  ;;  %v1010_v31 = vld [vmem:[%s1647_s5] ss:$0 sm:$0xff] }
 0x149   : > { %v692_v35 = vmax.f32 %v594_v32, 0.0 }
 0x14a   : > { %v598_v36 = vpop.f32.mrb[32].mxu0 }
 0x14b   : > { %v1176_v39 = vpack.c.bf16 %v692_v35, %v691_v34  ;;  %v600_v41 = vpop.f32.mrb[33].mxu0  ;;  %v599_v42 = vadd.f32 %v1510_v38, %v598_v36 }
 0x14c   : > { %v1261_v41 = vmov 0.0  }
 0x14d   : > { %v693_v47 = vmax.f32 %v599_v42, 0.0 }
 0x14e   : > { %v603_v43 = vpop.f32.mrb[34].mxu0 }
 0x14f   : > { %v604_v44 = vadd.f32 %v1510_v38, %v603_v43  ;;  %v605_v45 = vpop.f32.mrb[35].mxu0 }
 0x151   : > { %v694_v48 = vmax.f32 %v604_v44, 0.0 }
 0x152   : > { %v608_v49 = vpop.f32.mrb[36].mxu0 }
 0x153   : > { %v1146_v50 = vpack.c.bf16 %v694_v48, %v693_v47  ;;  %v610_v51 = vpop.f32.mrb[37].mxu0  ;;  %v609_v52 = vadd.f32 %v1510_v38, %v608_v49 }
 0x155   : > { %1147 = vmatprep.subr.bf16.mxu1 %v1146_v50  ;;  %v695_v59 = vmax.f32 %v609_v52, 0.0 }
 0x156   : > { %v613_v53 = vpop.f32.mrb[38].mxu0  ;;  %1149 = vmatpush3.bf16.msra.mxu1 %v1517_v54 }
 0x157   : > { %v614_v55 = vadd.f32 %v1510_v38, %v613_v53  ;;  %v615_v56 = vpop.f32.mrb[39].mxu0 }
 0x159   : > { %v696_v60 = vmax.f32 %v614_v55, 0.0 }
 0x15a   : > { %v618_v61 = vpop.f32.mrb[40].mxu0 }
 0x15b   : > { %v1150_v62 = vpack.c.bf16 %v696_v60, %v695_v59  ;;  %v619_v63 = vadd.f32 %v1510_v38, %v618_v61  ;;  %v620_v0 = vpop.f32.mrb[41].mxu0  ;;  %v788_v38 = vld [vmem:[%s1646_s4] sm:$0xff] }
 0x15c   : > { %v1178_v54 = vpack.c.bf16 %v789_v40, %v788_v38 }
 0x15d   : > { %v697_v4 = vmax.f32 %v619_v63, 0.0  ;;  %1151 = vmatprep.subr.bf16.mxu1 %v1150_v62 }
 0x15e   : > { %1153 = vmatpush3.bf16.msra.mxu1 %v1525_v8  ;;  %v791_v8 = vld [vmem:[%s1646_s4 + $0x18] sm:$0xff] }
 0x15f   : > { %v1154_v5 = vpack.c.bf16 %v698_v3, %v697_v4 }
 0x161   : > { %1155 = vmatprep.subr.bf16.mxu1 %v1154_v5 }
 0x162   : > { %1157 = vmatpush3.bf16.msra.mxu1 %v1533_v26  ;;  %v712_v26 = vld [vmem:[%s1645_s3 + $0x18] sm:$0xff] }
 0x163   : > { %1159 = vmatprep.subr.bf16.mxu1 %v1522_v1  ;;  %v790_v1 = vld [vmem:[%s1646_s4 + $0x10] sm:$0xff] }
 0x166   : > { %1161 = vmatpush3.bf16.msra.mxu1 %v1541_v46  ;;  %v792_v46 = vld [vmem:[%s1646_s4 + $0x20] sm:$0xff] }
 0x167   : > { %1163 = vmatprep.subr.bf16.mxu1 %v1530_v19  ;;  %v709_v19 = vld [vmem:[%s1645_s3] sm:$0xff] }
 0x16a   : > { %1165 = vmatpush3.bf16.msra.mxu1 %v1549_v2  ;;  %v711_v2 = vld [vmem:[%s1645_s3 + $0x10] sm:$0xff] }
 0x16b   : > { %1167 = vmatprep.subr.bf16.mxu1 %v1538_v37  ;;  %v1182_v37 = vpack.c.bf16 %v791_v8, %v790_v1 }
 0x16e   : > { %1169 = vmatpush3.bf16.msra.mxu1 %v1168_v17  ;;  %v800_v17 = vld [vmem:[%s1646_s4 + $0x60] sm:$0xff] }
 0x16f   : > { %1171 = vmatprep.subr.bf16.mxu1 %v1546_v58  ;;  %v793_v58 = vld [vmem:[%s1646_s4 + $0x28] sm:$0xff]  ;;  %v1202_v20 = vpack.c.bf16 %v801_v18, %v800_v17 }
 0x170   : > { %v1186_v6 = vpack.c.bf16 %v793_v58, %v792_v46 }
 0x172   : > { %1173 = vmatpush3.bf16.msra.mxu1 %v1172_v28 }
 0x173   : > { %1175 = vmatprep.subr.bf16.mxu1 %v1174_v13  ;;  %v1194_v13 = vpack.c.bf16 %v797_v12, %v796_v11 }
 0x176   : > { %1177 = vmatpush3.bf16.msra.mxu1 %v1176_v39 }
 0x177   : > { %1179 = vmatprep.subr.bf16.mxu1 %v1178_v54 }
 0x179   : > { %778 = vmatmul.mubr.f32.vlgmr.msra.gmra.mrb[22].mxu1 %v709_v19 }
 0x17a   : > { %782 = vmatprep.mubr.f32.mxu1 %v712_v26  ;;  %1181 = vmatpush3.bf16.msra.mxu1 %v1178_v54 }
 0x17b   : > { %1183 = vmatprep.subr.bf16.mxu1 %v1182_v37 }
 0x17d   : > { %783 = vmatmul.mubr.f32.gmra.mrb[24].mxu1 %v711_v2 }
 0x17e   : > { %1185 = vmatpush3.bf16.msra.mxu1 %v1182_v37 }
 0x17f   : > { %1187 = vmatprep.subr.bf16.mxu1 %v1186_v6 }
 0x182   : > { %1189 = vmatpush3.bf16.msra.mxu1 %v1186_v6 }
 0x183   : > { %1191 = vmatprep.subr.bf16.mxu1 %v1190_v10 }
 0x186   : > { %1193 = vmatpush3.bf16.msra.mxu1 %v1190_v10 }
 0x187   : > { %1195 = vmatprep.subr.bf16.mxu1 %v1194_v13 }
 0x18a   : > { %1197 = vmatpush3.bf16.msra.mxu1 %v1194_v13 }
 0x18b   : > { %1199 = vmatprep.subr.bf16.mxu1 %v1198_v16 }
 0x18e   : > { %1201 = vmatpush3.bf16.msra.mxu1 %v1198_v16 }
 0x18f   : > { %1203 = vmatprep.subr.bf16.mxu1 %v1202_v20 }
 0x192   : > { %1205 = vmatpush3.bf16.msra.mxu1 %v1202_v20 }
 0x193   : > { %1207 = vmatprep.subr.bf16.mxu1 %v1206_v23 }
 0x196   : > { %1209 = vmatpush3.bf16.msra.mxu1 %v1206_v23 }
 0x24c   : > { %v1051_v24 = vpop.f32.mrb[22].mxu1 }
 0x24d   : > { %v1052_v25 = vpop.f32.mrb[23].mxu1 }
 0x24e   : > { %v1053_v27 = vadd.f32 %v1052_v25, %v1051_v24 }
 0x250   : > { %v1054_v28 = vpop.f32.mrb[24].mxu1  ;;  %1107 = vmatprep.mubr.f32.mxu1 %v1053_v27 }
 0x251   : > { %v1055_v29 = vpop.f32.mrb[25].mxu1 }
 0x252   : > { %v1056_v30 = vadd.f32 %v1055_v29, %v1054_v28 }
 0x254   : > { %1108 = vmatmul.mubr.f32.vlgmr.msra.gmra.mrb[26].mxu1 %v1056_v30 }
 0x327   : > { %v1109_v32 = vpop.f32.mrb[26].mxu1 }
 0x328   : > { %v883_v33 = vadd.f32 %v1109_v32, %v1010_v31  ;;  %v877_v34 = vpop.f32.mrb[27].mxu1 }
 0x329   : > { %v878_v35 = vadd.f32 %v1010_v31, %v877_v34 }
 0x32a   : > { %v1012_v36 = vmul.f32 -1.442695, %v883_v33  ;;  %vm901_vm1 = vcmp.gt.f32.partialorder %v883_v33, 0.0 }
 0x32b   : > { %v1011_v39 = vmul.f32 -1.442695, %v878_v35  ;;  %vm900_vm2 = vcmp.gt.f32.partialorder %v878_v35, 0.0  ;;  %v1014_v43 = vsel %vm901_vm1, 1.0, %v1261_v41 }
 0x32c   : > { %1244 = vpow2.f32 %v1012_v36  ;;  %v1013_v42 = vsel %vm900_vm2, 1.0, %v1261_v41  ;;  %907 = vst [vmem:[%s258_s15 + $0x18] sm:$0xff] %v1014_v43 }
 0x32d   : > { %1246 = vpow2.f32 %v1011_v39  ;;  %906 = vst [vmem:[%s258_s15 + $0x8] sm:$0xff] %v1013_v42 }
 0x336   : > { %v1245_v44 = vpop.eup %1244 }
 0x337   : > { %v1247_v45 = vpop.eup %1246  ;;  %v893_v47 = vadd.f32 1.0, %v1245_v44 }
 0x338   : > { %v892_v48 = vadd.f32 1.0, %v1247_v45 }
 0x33a   : > { %1248 = vrcp.f32 %v892_v48 }
 0x33b   : > { %1250 = vrcp.f32 %v893_v47 }
 0x344   : > { %v1249_v49 = vpop.eup %1248 }
 0x345   : > { %v1251_v50 = vpop.eup %1250  ;;  %898 = vst [vmem:[%s258_s15] sm:$0xff] %v1249_v49 }
 0x346   : > { %899 = vst [vmem:[%s258_s15 + $0x10] sm:$0xff] %v1251_v50 }
 0x347 PF: > { %s16_s21 = sadd.s32 1, %s1258_s21  }
 0x348   : > { %p13_p5 = scmp.ge.s32.totalorder %s16_s21, 4  }
 0x34a   :  { %15 = sbr.rel (!%p13_p5) target bundleno = 1 (0x1), region = 74 }

</bundles_post_ra>
